<compile_context>
chip_gen: v7x
topology: tpu7x:2x2x1
jax: 0.10.0
libtpu: 0.0.40
codegen_flags: <defaults>
</compile_context>

<pallas_src>
import jax
import jax.numpy as jnp
from jax.experimental import pallas as pl
from jax.experimental.pallas import tpu as pltpu


NUM_HEADS = 4
_LANES = 128
# Per-step (single-buffer) VMEM payload target; ~2x that when double-buffered.
_VMEM_STEP_BUDGET = 8 * 1024 * 1024


def _default_max_rows():
    """Chip-dependent cap on sublane rows per block (pure-Python, trace-safe)."""
    try:
        kind = jax.devices()[0].device_kind.lower()
    except Exception:  # pragma: no cover - defensive
        return 512
    if "v6" in kind or "v7" in kind:
        # 1024 rows => ~6 MiB/step (C=4 loss path), ~12 MiB double-buffered:
        # well inside the 32 MiB default scoped VMEM on v6e / v7x.
        return 1024
    # v5e (16 MiB default scoped VMEM) and anything older/unknown: 512 rows
    # => ~3 MiB/step, ~6 MiB double-buffered.
    return 512


_MAX_BLOCK_ROWS = _default_max_rows()


def _ceil_to(x, m):
    return -(-x // m) * m


def _plan_tiling(hw, c):
    """Return (padded_lane_rows, sublane_rows_per_block) for a flattened H*W axis.

    Guarantees: block rows are a multiple of 8 (dense (8,128) f32 tiles), block
    rows divide padded rows exactly, and the per-step VMEM payload stays under
    budget.  Padding waste is capped at ~12.5% of the real rows."""
    nlanes = pl.cdiv(hw, _LANES)
    # Arrays touched per loss step: C channels of x + 4 targets + 4 preds.
    bytes_per_row = (c + 2 * NUM_HEADS) * _LANES * 4
    budget_rows = max(8, (_VMEM_STEP_BUDGET // bytes_per_row) // 8 * 8)
    max_rows = min(_MAX_BLOCK_ROWS, budget_rows)

    if nlanes <= max_rows:
        sb = max(8, _ceil_to(nlanes, 8))      # one dense tile per image
        return sb, sb

    # Biggest multiple-of-8 block with <= 1/8 padding waste (always terminates:
    # sb=8 gives waste <= 7 rows which is < nlanes/8 here).
    for sb in range(max_rows, 7, -8):
        padded = _ceil_to(nlanes, sb)
        if (padded - nlanes) * 8 <= nlanes:
            return padded, sb
    return _ceil_to(nlanes, 8), 8


# ----------------------------------------------------------------------------
# Kernels
# ----------------------------------------------------------------------------
def _forward_heads(w_ref, b_ref, x_ref):
    """Channel-outer / head-inner 1x1-conv on one (C, sb, 128) tile.

    Each x channel slab is read from VMEM exactly once and feeds all 4 head
    accumulators (VPU FMAs).  w (C,4) and b (1,4) live in SMEM and are read as
    scalars, so no tiny vector loads or lane broadcasts per step."""
    c_in = x_ref.shape[0]
    xc = x_ref[0]
    accs = [xc * w_ref[0, h] for h in range(NUM_HEADS)]
    for c in range(1, c_in):
        xc = x_ref[c]
        for h in range(NUM_HEADS):
            accs[h] = accs[h] + xc * w_ref[c, h]
    return [accs[h] + b_ref[0, h] for h in range(NUM_HEADS)]


def _forward_kernel(w_ref, b_ref, x_ref, pp_ref, pc_ref, ps_ref, pw_ref):
    preds = _forward_heads(w_ref, b_ref, x_ref)
    for p_ref, pred in zip((pp_ref, pc_ref, ps_ref, pw_ref), preds):
        p_ref[...] = pred                    # lane-dense unmasked store


def _make_loss_kernel(sb, hw, needs_mask):
    """Fused forward + smooth-L1 kernel.  `sb`/`hw`/`needs_mask` are static."""

    def kernel(w_ref, b_ref, x_ref,
               tp_ref, tc_ref, ts_ref, tw_ref,
               pp_ref, pc_ref, ps_ref, pw_ref, psum_ref):
        preds = _forward_heads(w_ref, b_ref, x_ref)
        t_refs = (tp_ref, tc_ref, ts_ref, tw_ref)
        p_refs = (pp_ref, pc_ref, ps_ref, pw_ref)

        if needs_mask:
            # Tail-pad mask: zero the Huber term for flattened positions >= H*W
            # of this image (robust regardless of what padded x/targets hold).
            t = pl.program_id(1)
            row_ids = jax.lax.broadcasted_iota(jnp.int32, (sb, _LANES), 0)
            lane_ids = jax.lax.broadcasted_iota(jnp.int32, (sb, _LANES), 1)
            valid = (t * sb + row_ids) * _LANES + lane_ids < hw

        rows = []
        for h in range(NUM_HEADS):           # unrolled, one head live at a time
            pred = preds[h]
            p_refs[h][...] = pred             # lane-dense unmasked store
            d = pred - t_refs[h][...]
            ad = jnp.abs(d)
            elem = jnp.where(ad < 1.0, 0.5 * d * d, ad - 0.5)   # smooth-L1, beta=1
            if needs_mask:
                elem = jnp.where(valid, elem, 0.0)
            rows.append(jnp.sum(elem, axis=0, keepdims=True))   # (1, 128) XLU reduce
        # Single stacked (4, 128) store (instead of 4 masked sub-sublane stores).
        psum_ref[...] = jnp.concatenate(rows, axis=0)

    return kernel


# ----------------------------------------------------------------------------
# Layout helpers.  Reshapes on contiguous axes are free; a pad copy only
# happens when H*W is not already a multiple of (block_rows * 128).
# TODO(synk): for padded real-image shapes, the pad copy could be removed
# entirely by letting the last tile be ragged and relying on the in-kernel mask.
# ----------------------------------------------------------------------------
def _prep_x(x_nchw, padded_rows):
    n, c, hgt, wid = x_nchw.shape
    hw = hgt * wid
    pad = padded_rows * _LANES - hw
    x_r = x_nchw.reshape(n, c, hw)
    if pad:
        x_r = jnp.pad(x_r, ((0, 0), (0, 0), (0, pad)))
    return x_r.reshape(n, c, padded_rows, _LANES)


def _prep_map(t_nchw, padded_rows):
    n = t_nchw.shape[0]
    hw = t_nchw.shape[-2] * t_nchw.shape[-1]
    pad = padded_rows * _LANES - hw
    t_r = t_nchw.reshape(n, hw)
    if pad:
        t_r = jnp.pad(t_r, ((0, 0), (0, pad)))
    return t_r.reshape(n, padded_rows, _LANES)


def _unprep_pred(p_r, n, hgt, wid):
    hw = hgt * wid
    return p_r.reshape(n, -1)[:, :hw].reshape(n, 1, hgt, wid)


_SMEM_SPEC = pl.BlockSpec(memory_space=pltpu.MemorySpace.SMEM)


# ----------------------------------------------------------------------------
# Pallas wrappers
# ----------------------------------------------------------------------------
@jax.jit
def _forward(x_nchw, w, b):
    n, c, hgt, wid = x_nchw.shape
    hw = hgt * wid
    padded_rows, sb = _plan_tiling(hw, c)
    tiles_per_n = padded_rows // sb

    x_r = _prep_x(x_nchw, padded_rows)

    x_spec = pl.BlockSpec((None, c, sb, _LANES), lambda ni, ti: (ni, 0, ti, 0))
    row_spec = pl.BlockSpec((None, sb, _LANES), lambda ni, ti: (ni, ti, 0))
    pred_shape = jax.ShapeDtypeStruct((n, padded_rows, _LANES), jnp.float32)

    preds = pl.pallas_call(
        _forward_kernel,
        grid=(n, tiles_per_n),
        in_specs=[_SMEM_SPEC, _SMEM_SPEC, x_spec],
        out_specs=[row_spec] * NUM_HEADS,
        out_shape=[pred_shape] * NUM_HEADS,
        compiler_params=pltpu.CompilerParams(
            dimension_semantics=("parallel", "parallel")),
    )(w, b, x_r)

    return tuple(_unprep_pred(p, n, hgt, wid) for p in preds)


@jax.jit
def _forward_and_loss(x_nchw, targets, w, b):
    n, c, hgt, wid = x_nchw.shape
    hw = hgt * wid
    padded_rows, sb = _plan_tiling(hw, c)
    tiles_per_n = padded_rows // sb
    needs_mask = (padded_rows * _LANES) != hw

    x_r = _prep_x(x_nchw, padded_rows)
    t_rs = [_prep_map(t, padded_rows) for t in targets]

    x_spec = pl.BlockSpec((None, c, sb, _LANES), lambda ni, ti: (ni, 0, ti, 0))
    row_spec = pl.BlockSpec((None, sb, _LANES), lambda ni, ti: (ni, ti, 0))
    psum_spec = pl.BlockSpec((None, None, NUM_HEADS, _LANES),
                             lambda ni, ti: (ni, ti, 0, 0))

    pred_shape = jax.ShapeDtypeStruct((n, padded_rows, _LANES), jnp.float32)
    psum_shape = jax.ShapeDtypeStruct((n, tiles_per_n, NUM_HEADS, _LANES),
                                      jnp.float32)

    outs = pl.pallas_call(
        _make_loss_kernel(sb, hw, needs_mask),
        grid=(n, tiles_per_n),
        in_specs=[_SMEM_SPEC, _SMEM_SPEC, x_spec,
                  row_spec, row_spec, row_spec, row_spec],
        out_specs=[row_spec] * NUM_HEADS + [psum_spec],
        out_shape=[pred_shape] * NUM_HEADS + [psum_shape],
        compiler_params=pltpu.CompilerParams(
            dimension_semantics=("parallel", "parallel")),
    )(w, b, x_r, *t_rs)

    preds = tuple(_unprep_pred(p, n, hgt, wid) for p in outs[:NUM_HEADS])
    psums = outs[NUM_HEADS]                                   # (N, tiles, 4, 128)
    means = jnp.sum(psums, axis=(0, 1, 3)) / jnp.float32(n * hw)   # (4,)
    return preds, means


# ----------------------------------------------------------------------------
# GraspModel in JAX
# ----------------------------------------------------------------------------
class GraspModel:
    """Mirror of the abstract PyTorch GraspModel with a synthetic head."""

    def __init__(self, in_channels=4, verbose=True):
        # TODO(synk): forward() raises NotImplementedError in the reference
        # abstract class; a deterministic 1x1-conv 4-head forward is
        # substituted here so the loss/predict paths can be exercised.
        self.in_channels = in_channels
        self.verbose = verbose
        kw = jax.random.PRNGKey(42)
        self.w = jax.random.normal(kw, (in_channels, NUM_HEADS),
                                   dtype=jnp.float32) * 0.1
        self.b = jnp.array([[0.0, 0.1, -0.1, 0.05]], dtype=jnp.float32)

    def __call__(self, x_in):
        return self.forward(x_in)

    def forward(self, x_in):
        # x_in: NCHW (N, C, H, W) float32 -> 4 maps, each (N, 1, H, W)
        return _forward(x_in, self.w, self.b)

    def compute_loss(self, xc, yc):
        # Fused forward + smooth-L1 kernel (same predictions as forward()).
        preds, means = _forward_and_loss(xc, tuple(yc), self.w, self.b)
        pos_pred, cos_pred, sin_pred, width_pred = preds
        p_loss, cos_loss, sin_loss, width_loss = (
            means[0], means[1], means[2], means[3])
        if self.verbose:
            # Mirrors the reference `print(p_loss)` without blocking dispatch.
            jax.debug.print("{p}", p=p_loss)
        return {
            'loss': p_loss + cos_loss + sin_loss + width_loss,
            'losses': {
                'p_loss': p_loss,
                'cos_loss': cos_loss,
                'sin_loss': sin_loss,
                'width_loss': width_loss,
            },
            'pred': {
                'pos': pos_pred,
                'cos': cos_pred,
                'sin': sin_pred,
                'width': width_pred,
            },
        }

    def predict(self, xc):
        pos_pred, cos_pred, sin_pred, width_pred = self(xc)
        return {
            'pos': pos_pred,
            'cos': cos_pred,
            'sin': sin_pred,
            'width': width_pred,
        }


if __name__ == "__main__":
    key = jax.random.PRNGKey(0)
    kx, kp, kc, ks, kw2 = jax.random.split(key, 5)

    N, C, H, W = 2, 4, 16, 16
    x = jax.random.normal(kx, (N, C, H, W), dtype=jnp.float32)
    y_pos = jax.random.normal(kp, (N, 1, H, W), dtype=jnp.float32)
    y_cos = jax.random.normal(kc, (N, 1, H, W), dtype=jnp.float32)
    y_sin = jax.random.normal(ks, (N, 1, H, W), dtype=jnp.float32)
    y_width = jax.random.normal(kw2, (N, 1, H, W), dtype=jnp.float32)
    targets = (y_pos, y_cos, y_sin, y_width)

    model = GraspModel(in_channels=C)

    out = model.compute_loss(x, targets)
    jax.block_until_ready(out['loss'])
    jax.block_until_ready(out['pred']['pos'])

    pred = model.predict(x)
    jax.block_until_ready(pred['width'])

    # --- correctness self-check against a pure-JAX reference ----------------
    ref_y = jnp.einsum("nchw,cd->ndhw", x, model.w) + model.b.reshape(1, NUM_HEADS, 1, 1)
    ref_preds = [ref_y[:, h:h + 1] for h in range(NUM_HEADS)]

    def ref_smooth_l1(p, t):
        d = p - t
        ad = jnp.abs(d)
        return jnp.mean(jnp.where(ad < 1.0, 0.5 * d * d, ad - 0.5))

    ref_losses = [ref_smooth_l1(p, t) for p, t in zip(ref_preds, targets)]

    assert jnp.allclose(out['pred']['pos'], ref_preds[0], atol=1e-5, rtol=1e-5)
    assert jnp.allclose(out['pred']['cos'], ref_preds[1], atol=1e-5, rtol=1e-5)
    assert jnp.allclose(out['pred']['sin'], ref_preds[2], atol=1e-5, rtol=1e-5)
    assert jnp.allclose(out['pred']['width'], ref_preds[3], atol=1e-5, rtol=1e-5)
    assert jnp.allclose(pred['width'], ref_preds[3], atol=1e-5, rtol=1e-5)
    assert jnp.allclose(out['losses']['p_loss'], ref_losses[0], atol=1e-5, rtol=1e-5)
    assert jnp.allclose(out['losses']['cos_loss'], ref_losses[1], atol=1e-5, rtol=1e-5)
    assert jnp.allclose(out['losses']['sin_loss'], ref_losses[2], atol=1e-5, rtol=1e-5)
    assert jnp.allclose(out['losses']['width_loss'], ref_losses[3], atol=1e-5, rtol=1e-5)
    assert jnp.allclose(out['loss'], sum(ref_losses), atol=1e-5, rtol=1e-5)

    print("KERNEL_OK")
</pallas_src>

<mosaic_0001>
module attributes {stable_mosaic.version = 11 : i64} {
  func.func @kernel(%arg0: i32, %arg1: i32, %arg2: memref<4x4xf32, #tpu.memory_space<smem>>, %arg3: memref<1x4xf32, #tpu.memory_space<smem>>, %arg4: memref<1x4x8x128xf32, #tpu.memory_space<vmem>>, %arg5: memref<1x8x128xf32, #tpu.memory_space<vmem>>, %arg6: memref<1x8x128xf32, #tpu.memory_space<vmem>>, %arg7: memref<1x8x128xf32, #tpu.memory_space<vmem>>, %arg8: memref<1x8x128xf32, #tpu.memory_space<vmem>>, %arg9: memref<1x8x128xf32, #tpu.memory_space<vmem>>, %arg10: memref<1x8x128xf32, #tpu.memory_space<vmem>>, %arg11: memref<1x8x128xf32, #tpu.memory_space<vmem>>, %arg12: memref<1x8x128xf32, #tpu.memory_space<vmem>>, %arg13: memref<1x1x4x128xf32, #tpu.memory_space<vmem>>) attributes {dimension_semantics = [#tpu.dimension_semantics<parallel>, #tpu.dimension_semantics<parallel>], iteration_bounds = array<i64: 2, 1>, scalar_prefetch = 0 : i64, scratch_operands = 0 : i64, tpu.core_type = #tpu.core_type<tc>, window_params = [{transform_indices = @transform_0, window_bounds = array<i64: 4, 4>}, {transform_indices = @transform_1, window_bounds = array<i64: 1, 4>}, {transform_indices = @transform_2, window_bounds = array<i64: 1, 4, 8, 128>}, {transform_indices = @transform_3, window_bounds = array<i64: 1, 8, 128>}, {transform_indices = @transform_4, window_bounds = array<i64: 1, 8, 128>}, {transform_indices = @transform_5, window_bounds = array<i64: 1, 8, 128>}, {transform_indices = @transform_6, window_bounds = array<i64: 1, 8, 128>}, {transform_indices = @transform_7, window_bounds = array<i64: 1, 8, 128>}, {transform_indices = @transform_8, window_bounds = array<i64: 1, 8, 128>}, {transform_indices = @transform_9, window_bounds = array<i64: 1, 8, 128>}, {transform_indices = @transform_10, window_bounds = array<i64: 1, 8, 128>}, {transform_indices = @transform_11, window_bounds = array<i64: 1, 1, 4, 128>}]} {
    %c0 = arith.constant 0 : index
    %c0_0 = arith.constant 0 : index
    %c0_1 = arith.constant 0 : index
    %c0_2 = arith.constant 0 : index
    %0 = vector.load %arg4[%c0, %c0_0, %c0_1, %c0_2] : memref<1x4x8x128xf32, #tpu.memory_space<vmem>>, vector<1x1x8x128xf32>
    %1 = vector.shape_cast %0 : vector<1x1x8x128xf32> to vector<8x128xf32>
    %c0_3 = arith.constant 0 : index
    %c0_4 = arith.constant 0 : index
    %2 = memref.load %arg2[%c0_3, %c0_4] : memref<4x4xf32, #tpu.memory_space<smem>>
    %3 = vector.broadcast %2 : f32 to vector<8x128xf32>
    %4 = arith.mulf %1, %3 : vector<8x128xf32>
    %c0_5 = arith.constant 0 : index
    %c1 = arith.constant 1 : index
    %5 = memref.load %arg2[%c0_5, %c1] : memref<4x4xf32, #tpu.memory_space<smem>>
    %6 = vector.broadcast %5 : f32 to vector<8x128xf32>
    %7 = arith.mulf %1, %6 : vector<8x128xf32>
    %c0_6 = arith.constant 0 : index
    %c2 = arith.constant 2 : index
    %8 = memref.load %arg2[%c0_6, %c2] : memref<4x4xf32, #tpu.memory_space<smem>>
    %9 = vector.broadcast %8 : f32 to vector<8x128xf32>
    %10 = arith.mulf %1, %9 : vector<8x128xf32>
    %c0_7 = arith.constant 0 : index
    %c3 = arith.constant 3 : index
    %11 = memref.load %arg2[%c0_7, %c3] : memref<4x4xf32, #tpu.memory_space<smem>>
    %12 = vector.broadcast %11 : f32 to vector<8x128xf32>
    %13 = arith.mulf %1, %12 : vector<8x128xf32>
    %c0_8 = arith.constant 0 : index
    %c1_9 = arith.constant 1 : index
    %c0_10 = arith.constant 0 : index
    %c0_11 = arith.constant 0 : index
    %14 = vector.load %arg4[%c0_8, %c1_9, %c0_10, %c0_11] : memref<1x4x8x128xf32, #tpu.memory_space<vmem>>, vector<1x1x8x128xf32>
    %15 = vector.shape_cast %14 : vector<1x1x8x128xf32> to vector<8x128xf32>
    %c1_12 = arith.constant 1 : index
    %c0_13 = arith.constant 0 : index
    %16 = memref.load %arg2[%c1_12, %c0_13] : memref<4x4xf32, #tpu.memory_space<smem>>
    %17 = vector.broadcast %16 : f32 to vector<8x128xf32>
    %18 = arith.mulf %15, %17 : vector<8x128xf32>
    %19 = arith.addf %4, %18 : vector<8x128xf32>
    %c1_14 = arith.constant 1 : index
    %c1_15 = arith.constant 1 : index
    %20 = memref.load %arg2[%c1_14, %c1_15] : memref<4x4xf32, #tpu.memory_space<smem>>
    %21 = vector.broadcast %20 : f32 to vector<8x128xf32>
    %22 = arith.mulf %15, %21 : vector<8x128xf32>
    %23 = arith.addf %7, %22 : vector<8x128xf32>
    %c1_16 = arith.constant 1 : index
    %c2_17 = arith.constant 2 : index
    %24 = memref.load %arg2[%c1_16, %c2_17] : memref<4x4xf32, #tpu.memory_space<smem>>
    %25 = vector.broadcast %24 : f32 to vector<8x128xf32>
    %26 = arith.mulf %15, %25 : vector<8x128xf32>
    %27 = arith.addf %10, %26 : vector<8x128xf32>
    %c1_18 = arith.constant 1 : index
    %c3_19 = arith.constant 3 : index
    %28 = memref.load %arg2[%c1_18, %c3_19] : memref<4x4xf32, #tpu.memory_space<smem>>
    %29 = vector.broadcast %28 : f32 to vector<8x128xf32>
    %30 = arith.mulf %15, %29 : vector<8x128xf32>
    %31 = arith.addf %13, %30 : vector<8x128xf32>
    %c0_20 = arith.constant 0 : index
    %c2_21 = arith.constant 2 : index
    %c0_22 = arith.constant 0 : index
    %c0_23 = arith.constant 0 : index
    %32 = vector.load %arg4[%c0_20, %c2_21, %c0_22, %c0_23] : memref<1x4x8x128xf32, #tpu.memory_space<vmem>>, vector<1x1x8x128xf32>
    %33 = vector.shape_cast %32 : vector<1x1x8x128xf32> to vector<8x128xf32>
    %c2_24 = arith.constant 2 : index
    %c0_25 = arith.constant 0 : index
    %34 = memref.load %arg2[%c2_24, %c0_25] : memref<4x4xf32, #tpu.memory_space<smem>>
    %35 = vector.broadcast %34 : f32 to vector<8x128xf32>
    %36 = arith.mulf %33, %35 : vector<8x128xf32>
    %37 = arith.addf %19, %36 : vector<8x128xf32>
    %c2_26 = arith.constant 2 : index
    %c1_27 = arith.constant 1 : index
    %38 = memref.load %arg2[%c2_26, %c1_27] : memref<4x4xf32, #tpu.memory_space<smem>>
    %39 = vector.broadcast %38 : f32 to vector<8x128xf32>
    %40 = arith.mulf %33, %39 : vector<8x128xf32>
    %41 = arith.addf %23, %40 : vector<8x128xf32>
    %c2_28 = arith.constant 2 : index
    %c2_29 = arith.constant 2 : index
    %42 = memref.load %arg2[%c2_28, %c2_29] : memref<4x4xf32, #tpu.memory_space<smem>>
    %43 = vector.broadcast %42 : f32 to vector<8x128xf32>
    %44 = arith.mulf %33, %43 : vector<8x128xf32>
    %45 = arith.addf %27, %44 : vector<8x128xf32>
    %c2_30 = arith.constant 2 : index
    %c3_31 = arith.constant 3 : index
    %46 = memref.load %arg2[%c2_30, %c3_31] : memref<4x4xf32, #tpu.memory_space<smem>>
    %47 = vector.broadcast %46 : f32 to vector<8x128xf32>
    %48 = arith.mulf %33, %47 : vector<8x128xf32>
    %49 = arith.addf %31, %48 : vector<8x128xf32>
    %c0_32 = arith.constant 0 : index
    %c3_33 = arith.constant 3 : index
    %c0_34 = arith.constant 0 : index
    %c0_35 = arith.constant 0 : index
    %50 = vector.load %arg4[%c0_32, %c3_33, %c0_34, %c0_35] : memref<1x4x8x128xf32, #tpu.memory_space<vmem>>, vector<1x1x8x128xf32>
    %51 = vector.shape_cast %50 : vector<1x1x8x128xf32> to vector<8x128xf32>
    %c3_36 = arith.constant 3 : index
    %c0_37 = arith.constant 0 : index
    %52 = memref.load %arg2[%c3_36, %c0_37] : memref<4x4xf32, #tpu.memory_space<smem>>
    %53 = vector.broadcast %52 : f32 to vector<8x128xf32>
    %54 = arith.mulf %51, %53 : vector<8x128xf32>
    %55 = arith.addf %37, %54 : vector<8x128xf32>
    %c3_38 = arith.constant 3 : index
    %c1_39 = arith.constant 1 : index
    %56 = memref.load %arg2[%c3_38, %c1_39] : memref<4x4xf32, #tpu.memory_space<smem>>
    %57 = vector.broadcast %56 : f32 to vector<8x128xf32>
    %58 = arith.mulf %51, %57 : vector<8x128xf32>
    %59 = arith.addf %41, %58 : vector<8x128xf32>
    %c3_40 = arith.constant 3 : index
    %c2_41 = arith.constant 2 : index
    %60 = memref.load %arg2[%c3_40, %c2_41] : memref<4x4xf32, #tpu.memory_space<smem>>
    %61 = vector.broadcast %60 : f32 to vector<8x128xf32>
    %62 = arith.mulf %51, %61 : vector<8x128xf32>
    %63 = arith.addf %45, %62 : vector<8x128xf32>
    %c3_42 = arith.constant 3 : index
    %c3_43 = arith.constant 3 : index
    %64 = memref.load %arg2[%c3_42, %c3_43] : memref<4x4xf32, #tpu.memory_space<smem>>
    %65 = vector.broadcast %64 : f32 to vector<8x128xf32>
    %66 = arith.mulf %51, %65 : vector<8x128xf32>
    %67 = arith.addf %49, %66 : vector<8x128xf32>
    %c0_44 = arith.constant 0 : index
    %c0_45 = arith.constant 0 : index
    %68 = memref.load %arg3[%c0_44, %c0_45] : memref<1x4xf32, #tpu.memory_space<smem>>
    %69 = vector.broadcast %68 : f32 to vector<8x128xf32>
    %70 = arith.addf %55, %69 : vector<8x128xf32>
    %c0_46 = arith.constant 0 : index
    %c1_47 = arith.constant 1 : index
    %71 = memref.load %arg3[%c0_46, %c1_47] : memref<1x4xf32, #tpu.memory_space<smem>>
    %72 = vector.broadcast %71 : f32 to vector<8x128xf32>
    %73 = arith.addf %59, %72 : vector<8x128xf32>
    %c0_48 = arith.constant 0 : index
    %c2_49 = arith.constant 2 : index
    %74 = memref.load %arg3[%c0_48, %c2_49] : memref<1x4xf32, #tpu.memory_space<smem>>
    %75 = vector.broadcast %74 : f32 to vector<8x128xf32>
    %76 = arith.addf %63, %75 : vector<8x128xf32>
    %c0_50 = arith.constant 0 : index
    %c3_51 = arith.constant 3 : index
    %77 = memref.load %arg3[%c0_50, %c3_51] : memref<1x4xf32, #tpu.memory_space<smem>>
    %78 = vector.broadcast %77 : f32 to vector<8x128xf32>
    %79 = arith.addf %67, %78 : vector<8x128xf32>
    %80 = tpu.iota {dimensions = array<i32: 0>} : vector<8x128xi32>
    %81 = tpu.iota {dimensions = array<i32: 1>} : vector<8x128xi32>
    %c8_i32 = arith.constant 8 : i32
    %82 = arith.muli %arg1, %c8_i32 : i32
    %83 = vector.broadcast %82 : i32 to vector<8x128xi32>
    %84 = arith.addi %83, %80 : vector<8x128xi32>
    %c128_i32 = arith.constant 128 : i32
    %85 = vector.broadcast %c128_i32 : i32 to vector<8x128xi32>
    %86 = arith.muli %84, %85 : vector<8x128xi32>
    %87 = arith.addi %86, %81 : vector<8x128xi32>
    %c256_i32 = arith.constant 256 : i32
    %88 = vector.broadcast %c256_i32 : i32 to vector<8x128xi32>
    %89 = arith.cmpi slt, %87, %88 : vector<8x128xi32>
    %c0_52 = arith.constant 0 : index
    %c0_53 = arith.constant 0 : index
    %c0_54 = arith.constant 0 : index
    %90 = vector.load %arg9[%c0_52, %c0_53, %c0_54] : memref<1x8x128xf32, #tpu.memory_space<vmem>>, vector<1x8x128xf32>
    %91 = vector.shape_cast %90 : vector<1x8x128xf32> to vector<8x128xf32>
    %92 = vector.shape_cast %70 : vector<8x128xf32> to vector<1x8x128xf32>
    tpu.vector_store %arg9[%c0_52, %c0_53, %c0_54], %92 {strides = array<i32>} : memref<1x8x128xf32, #tpu.memory_space<vmem>>, vector<1x8x128xf32>,
    %c0_55 = arith.constant 0 : index
    %c0_56 = arith.constant 0 : index
    %c0_57 = arith.constant 0 : index
    %93 = vector.load %arg5[%c0_55, %c0_56, %c0_57] : memref<1x8x128xf32, #tpu.memory_space<vmem>>, vector<1x8x128xf32>
    %94 = vector.shape_cast %93 : vector<1x8x128xf32> to vector<8x128xf32>
    %95 = arith.subf %70, %94 : vector<8x128xf32>
    %96 = math.absf %95 : vector<8x128xf32>
    %cst = arith.constant 1.000000e+00 : f32
    %97 = vector.broadcast %cst : f32 to vector<8x128xf32>
    %98 = arith.cmpf olt, %96, %97 : vector<8x128xf32>
    %cst_58 = arith.constant 5.000000e-01 : f32
    %99 = vector.broadcast %cst_58 : f32 to vector<8x128xf32>
    %100 = arith.mulf %99, %95 : vector<8x128xf32>
    %101 = arith.mulf %100, %95 : vector<8x128xf32>
    %cst_59 = arith.constant 5.000000e-01 : f32
    %102 = vector.broadcast %cst_59 : f32 to vector<8x128xf32>
    %103 = arith.subf %96, %102 : vector<8x128xf32>
    %104 = arith.select %98, %101, %103 : vector<8x128xi1>, vector<8x128xf32>
    %cst_60 = arith.constant 0.000000e+00 : f32
    %105 = vector.broadcast %cst_60 : f32 to vector<8x128xf32>
    %106 = arith.select %89, %104, %105 : vector<8x128xi1>, vector<8x128xf32>
    %cst_61 = arith.constant dense<0.000000e+00> : vector<128xf32>
    %107 = vector.multi_reduction <add>, %106, %cst_61 [0] : vector<8x128xf32> to vector<128xf32>
    %108 = vector.shape_cast %107 : vector<128xf32> to vector<1x128xf32>
    %c0_62 = arith.constant 0 : index
    %c0_63 = arith.constant 0 : index
    %c0_64 = arith.constant 0 : index
    %109 = vector.load %arg10[%c0_62, %c0_63, %c0_64] : memref<1x8x128xf32, #tpu.memory_space<vmem>>, vector<1x8x128xf32>
    %110 = vector.shape_cast %109 : vector<1x8x128xf32> to vector<8x128xf32>
    %111 = vector.shape_cast %73 : vector<8x128xf32> to vector<1x8x128xf32>
    tpu.vector_store %arg10[%c0_62, %c0_63, %c0_64], %111 {strides = array<i32>} : memref<1x8x128xf32, #tpu.memory_space<vmem>>, vector<1x8x128xf32>,
    %c0_65 = arith.constant 0 : index
    %c0_66 = arith.constant 0 : index
    %c0_67 = arith.constant 0 : index
    %112 = vector.load %arg6[%c0_65, %c0_66, %c0_67] : memref<1x8x128xf32, #tpu.memory_space<vmem>>, vector<1x8x128xf32>
    %113 = vector.shape_cast %112 : vector<1x8x128xf32> to vector<8x128xf32>
    %114 = arith.subf %73, %113 : vector<8x128xf32>
    %115 = math.absf %114 : vector<8x128xf32>
    %cst_68 = arith.constant 1.000000e+00 : f32
    %116 = vector.broadcast %cst_68 : f32 to vector<8x128xf32>
    %117 = arith.cmpf olt, %115, %116 : vector<8x128xf32>
    %cst_69 = arith.constant 5.000000e-01 : f32
    %118 = vector.broadcast %cst_69 : f32 to vector<8x128xf32>
    %119 = arith.mulf %118, %114 : vector<8x128xf32>
    %120 = arith.mulf %119, %114 : vector<8x128xf32>
    %cst_70 = arith.constant 5.000000e-01 : f32
    %121 = vector.broadcast %cst_70 : f32 to vector<8x128xf32>
    %122 = arith.subf %115, %121 : vector<8x128xf32>
    %123 = arith.select %117, %120, %122 : vector<8x128xi1>, vector<8x128xf32>
    %cst_71 = arith.constant 0.000000e+00 : f32
    %124 = vector.broadcast %cst_71 : f32 to vector<8x128xf32>
    %125 = arith.select %89, %123, %124 : vector<8x128xi1>, vector<8x128xf32>
    %cst_72 = arith.constant dense<0.000000e+00> : vector<128xf32>
    %126 = vector.multi_reduction <add>, %125, %cst_72 [0] : vector<8x128xf32> to vector<128xf32>
    %127 = vector.shape_cast %126 : vector<128xf32> to vector<1x128xf32>
    %c0_73 = arith.constant 0 : index
    %c0_74 = arith.constant 0 : index
    %c0_75 = arith.constant 0 : index
    %128 = vector.load %arg11[%c0_73, %c0_74, %c0_75] : memref<1x8x128xf32, #tpu.memory_space<vmem>>, vector<1x8x128xf32>
    %129 = vector.shape_cast %128 : vector<1x8x128xf32> to vector<8x128xf32>
    %130 = vector.shape_cast %76 : vector<8x128xf32> to vector<1x8x128xf32>
    tpu.vector_store %arg11[%c0_73, %c0_74, %c0_75], %130 {strides = array<i32>} : memref<1x8x128xf32, #tpu.memory_space<vmem>>, vector<1x8x128xf32>,
    %c0_76 = arith.constant 0 : index
    %c0_77 = arith.constant 0 : index
    %c0_78 = arith.constant 0 : index
    %131 = vector.load %arg7[%c0_76, %c0_77, %c0_78] : memref<1x8x128xf32, #tpu.memory_space<vmem>>, vector<1x8x128xf32>
    %132 = vector.shape_cast %131 : vector<1x8x128xf32> to vector<8x128xf32>
    %133 = arith.subf %76, %132 : vector<8x128xf32>
    %134 = math.absf %133 : vector<8x128xf32>
    %cst_79 = arith.constant 1.000000e+00 : f32
    %135 = vector.broadcast %cst_79 : f32 to vector<8x128xf32>
    %136 = arith.cmpf olt, %134, %135 : vector<8x128xf32>
    %cst_80 = arith.constant 5.000000e-01 : f32
    %137 = vector.broadcast %cst_80 : f32 to vector<8x128xf32>
    %138 = arith.mulf %137, %133 : vector<8x128xf32>
    %139 = arith.mulf %138, %133 : vector<8x128xf32>
    %cst_81 = arith.constant 5.000000e-01 : f32
    %140 = vector.broadcast %cst_81 : f32 to vector<8x128xf32>
    %141 = arith.subf %134, %140 : vector<8x128xf32>
    %142 = arith.select %136, %139, %141 : vector<8x128xi1>, vector<8x128xf32>
    %cst_82 = arith.constant 0.000000e+00 : f32
    %143 = vector.broadcast %cst_82 : f32 to vector<8x128xf32>
    %144 = arith.select %89, %142, %143 : vector<8x128xi1>, vector<8x128xf32>
    %cst_83 = arith.constant dense<0.000000e+00> : vector<128xf32>
    %145 = vector.multi_reduction <add>, %144, %cst_83 [0] : vector<8x128xf32> to vector<128xf32>
    %146 = vector.shape_cast %145 : vector<128xf32> to vector<1x128xf32>
    %c0_84 = arith.constant 0 : index
    %c0_85 = arith.constant 0 : index
    %c0_86 = arith.constant 0 : index
    %147 = vector.load %arg12[%c0_84, %c0_85, %c0_86] : memref<1x8x128xf32, #tpu.memory_space<vmem>>, vector<1x8x128xf32>
    %148 = vector.shape_cast %147 : vector<1x8x128xf32> to vector<8x128xf32>
    %149 = vector.shape_cast %79 : vector<8x128xf32> to vector<1x8x128xf32>
    tpu.vector_store %arg12[%c0_84, %c0_85, %c0_86], %149 {strides = array<i32>} : memref<1x8x128xf32, #tpu.memory_space<vmem>>, vector<1x8x128xf32>,
    %c0_87 = arith.constant 0 : index
    %c0_88 = arith.constant 0 : index
    %c0_89 = arith.constant 0 : index
    %150 = vector.load %arg8[%c0_87, %c0_88, %c0_89] : memref<1x8x128xf32, #tpu.memory_space<vmem>>, vector<1x8x128xf32>
    %151 = vector.shape_cast %150 : vector<1x8x128xf32> to vector<8x128xf32>
    %152 = arith.subf %79, %151 : vector<8x128xf32>
    %153 = math.absf %152 : vector<8x128xf32>
    %cst_90 = arith.constant 1.000000e+00 : f32
    %154 = vector.broadcast %cst_90 : f32 to vector<8x128xf32>
    %155 = arith.cmpf olt, %153, %154 : vector<8x128xf32>
    %cst_91 = arith.constant 5.000000e-01 : f32
    %156 = vector.broadcast %cst_91 : f32 to vector<8x128xf32>
    %157 = arith.mulf %156, %152 : vector<8x128xf32>
    %158 = arith.mulf %157, %152 : vector<8x128xf32>
    %cst_92 = arith.constant 5.000000e-01 : f32
    %159 = vector.broadcast %cst_92 : f32 to vector<8x128xf32>
    %160 = arith.subf %153, %159 : vector<8x128xf32>
    %161 = arith.select %155, %158, %160 : vector<8x128xi1>, vector<8x128xf32>
    %cst_93 = arith.constant 0.000000e+00 : f32
    %162 = vector.broadcast %cst_93 : f32 to vector<8x128xf32>
    %163 = arith.select %89, %161, %162 : vector<8x128xi1>, vector<8x128xf32>
    %cst_94 = arith.constant dense<0.000000e+00> : vector<128xf32>
    %164 = vector.multi_reduction <add>, %163, %cst_94 [0] : vector<8x128xf32> to vector<128xf32>
    %165 = vector.shape_cast %164 : vector<128xf32> to vector<1x128xf32>
    %166 = tpu.concatenate %108, %127, %146, %165 in 0 : vector<1x128xf32>, vector<1x128xf32>, vector<1x128xf32>, vector<1x128xf32> -> vector<4x128xf32>
    %c0_95 = arith.constant 0 : index
    %c0_96 = arith.constant 0 : index
    %c0_97 = arith.constant 0 : index
    %c0_98 = arith.constant 0 : index
    %167 = vector.load %arg13[%c0_95, %c0_96, %c0_97, %c0_98] : memref<1x1x4x128xf32, #tpu.memory_space<vmem>>, vector<1x1x4x128xf32>
    %168 = vector.shape_cast %167 : vector<1x1x4x128xf32> to vector<4x128xf32>
    %169 = vector.shape_cast %166 : vector<4x128xf32> to vector<1x1x4x128xf32>
    tpu.vector_store %arg13[%c0_95, %c0_96, %c0_97, %c0_98], %169 {strides = array<i32>} : memref<1x1x4x128xf32, #tpu.memory_space<vmem>>, vector<1x1x4x128xf32>,
    return
  }
  func.func @transform_0(%arg0: i32, %arg1: i32) -> (i32, i32) {
    %c0_i32 = arith.constant 0 : i32
    %c0_i32_0 = arith.constant 0 : i32
    %c0_i32_1 = arith.constant 0 : i32
    return %c0_i32, %c0_i32_0 : i32, i32
  }
  func.func @transform_1(%arg0: i32, %arg1: i32) -> (i32, i32) {
    %c0_i32 = arith.constant 0 : i32
    %c0_i32_0 = arith.constant 0 : i32
    %c0_i32_1 = arith.constant 0 : i32
    return %c0_i32, %c0_i32_0 : i32, i32
  }
  func.func @transform_2(%arg0: i32, %arg1: i32) -> (i32, i32, i32, i32) {
    %c0_i32 = arith.constant 0 : i32
    %c0_i32_0 = arith.constant 0 : i32
    %c0_i32_1 = arith.constant 0 : i32
    return %arg0, %c0_i32, %arg1, %c0_i32_0 : i32, i32, i32, i32
  }
  func.func @transform_3(%arg0: i32, %arg1: i32) -> (i32, i32, i32) {
    %c0_i32 = arith.constant 0 : i32
    %c0_i32_0 = arith.constant 0 : i32
    return %arg0, %arg1, %c0_i32 : i32, i32, i32
  }
  func.func @transform_4(%arg0: i32, %arg1: i32) -> (i32, i32, i32) {
    %c0_i32 = arith.constant 0 : i32
    %c0_i32_0 = arith.constant 0 : i32
    return %arg0, %arg1, %c0_i32 : i32, i32, i32
  }
  func.func @transform_5(%arg0: i32, %arg1: i32) -> (i32, i32, i32) {
    %c0_i32 = arith.constant 0 : i32
    %c0_i32_0 = arith.constant 0 : i32
    return %arg0, %arg1, %c0_i32 : i32, i32, i32
  }
  func.func @transform_6(%arg0: i32, %arg1: i32) -> (i32, i32, i32) {
    %c0_i32 = arith.constant 0 : i32
    %c0_i32_0 = arith.constant 0 : i32
    return %arg0, %arg1, %c0_i32 : i32, i32, i32
  }
  func.func @transform_7(%arg0: i32, %arg1: i32) -> (i32, i32, i32) {
    %c0_i32 = arith.constant 0 : i32
    %c0_i32_0 = arith.constant 0 : i32
    return %arg0, %arg1, %c0_i32 : i32, i32, i32
  }
  func.func @transform_8(%arg0: i32, %arg1: i32) -> (i32, i32, i32) {
    %c0_i32 = arith.constant 0 : i32
    %c0_i32_0 = arith.constant 0 : i32
    return %arg0, %arg1, %c0_i32 : i32, i32, i32
  }
  func.func @transform_9(%arg0: i32, %arg1: i32) -> (i32, i32, i32) {
    %c0_i32 = arith.constant 0 : i32
    %c0_i32_0 = arith.constant 0 : i32
    return %arg0, %arg1, %c0_i32 : i32, i32, i32
  }
  func.func @transform_10(%arg0: i32, %arg1: i32) -> (i32, i32, i32) {
    %c0_i32 = arith.constant 0 : i32
    %c0_i32_0 = arith.constant 0 : i32
    return %arg0, %arg1, %c0_i32 : i32, i32, i32
  }
  func.func @transform_11(%arg0: i32, %arg1: i32) -> (i32, i32, i32, i32) {
    %c0_i32 = arith.constant 0 : i32
    %c0_i32_0 = arith.constant 0 : i32
    %c0_i32_1 = arith.constant 0 : i32
    return %arg0, %arg1, %c0_i32, %c0_i32_0 : i32, i32, i32, i32
  }
}

</mosaic_0001>

<bundles_post_ra>
// kernel: _forward_and_loss.1
= control target key start
LH: loop header
LB: loop body
LE: loop exit
PB: predicated region body
PF: predicated region fallthrough
CT: control target
= control target key end

     0   :  { %s1518_s0 = inlined_call_operand.vmem [shape: f32[4,4], index: 0, kind: input, shape index: {}]   ;;  %s1519_s1 = inlined_call_operand.vmem [shape: f32[1,4], index: 1, kind: input, shape index: {}]   ;;  %s1520_s2 = inlined_call_operand.vmem [shape: f32[2,4,8,128], index: 2, kind: input, shape index: {}]   ;;  %s1521_s3 = inlined_call_operand.vmem [shape: f32[2,8,128], index: 3, kind: input, shape index: {}]   ;;  %s1522_s4 = inlined_call_operand.vmem [shape: f32[2,8,128], index: 4, kind: input, shape index: {}]   ;;  %s1523_s5 = inlined_call_operand.vmem [shape: f32[2,8,128], index: 5, kind: input, shape index: {}]   ;;  %s1524_s6 = inlined_call_operand.vmem [shape: f32[2,8,128], index: 6, kind: input, shape index: {}]   ;;  %s1525_s7 = inlined_call_operand.vmem [shape: f32[2,8,128], index: 7, kind: output, shape index: {0}]   ;;  %s1526_s8 = inlined_call_operand.vmem [shape: f32[2,8,128], index: 8, kind: output, shape index: {1}]   ;;  %s1527_s9 = inlined_call_operand.vmem [shape: f32[2,8,128], index: 9, kind: output, shape index: {2}]   ;;  %s1528_s10 = inlined_call_operand.vmem [shape: f32[2,8,128], index: 10, kind: output, shape index: {3}]   ;;  %s1529_s11 = inlined_call_operand.vmem [shape: f32[2,1,4,128], index: 11, kind: output, shape index: {4}]  }
   0x1   :  { %1533 = sst [smem:[#allocation8_spill]] %s1518_s0 }
   0x2   :  { %1534 = sst [smem:[#allocation9_spill]] %s1519_s1 }
   0x3   :  { %17 = vsyncpa [#allocation3], 0 }
   0x4   :  { %18 = vsyncpa [#allocation5], 0  ;;  %s1329_s17 = smov 0   ;;  %s1331_s18 = smov 0  }
   0x5   :  { %s1333_s19 = smov 0  }
   0x6 LB: > { %s1112_s20 = sadd.s32 4294967295, %s1265_s19   ;;  %s36_s21 = sadd.s32 1, %s1261_s18  ;;  %s1265_s19 = sphi %s1333_s19, %s24_s19   ;;  %s1261_s18 = sphi %s1331_s18, %s1543_s18   ;;  %s1257_s17 = sphi %s1329_s17, %s1542_s17  }
   0x7   : > { %p38_p0 = scmp.ge.s32.totalorder %s36_s21, 2  ;;  %p1114_p1 = scmp.ge.s32.totalorder %s1265_s19, 1 }
   0x8   : > { %p363_p2 = scmp.lt.s32.totalorder %s1265_s19, 3  ;;  %p1354_p4 = scmp.eq.s32.totalorder %s1112_s20, 0 }
   0x9   : > { %s1545_s21 = smov (%p38_p0, %s36_s21), 0  ;;  %s1537_s0 = sld [smem:[#allocation8_spill]] }
   0xa   : > { %p1350_p3 = pnand %p1114_p1, %p363_p2  ;;  %s1538_s1 = sld [smem:[#allocation9_spill]] }
   0xb   : > { %s1536_s23 = scalar_select %p1354_p4, 1, 0 }
   0xc   : > { %s1535_s22 = scalar_select %p1350_p3, 1, 0 }
   0xd   : > { %p1168_p5 = pneg %p1350_p3 }
   0xf   : > { %s376_s26 = sshll.u32 %s1537_s0, 4  ;;  %p1368_p6 = pnand %p1354_p4, %p1168_p5  ;;  %s377_s26 = int_to_ptr.vmem [resolvable:$true] %s376_s26 }
  0x10   : > { %s387_s29 = sshll.u32 %s1538_s1, 4  ;;  %s1205_s12 = scalar_lea.vmem %s377_s26, 64  ;;  %s388_s29 = int_to_ptr.vmem [resolvable:$true] %s387_s29 }
  0x11   : > { %p1206_p7 = scmp.ne.s32.totalorder %s377_s26, %s1205_s12  ;;  %p1207_p8 = pneg %p1368_p6 }
  0x12   : > { %p1213_p11 = scmp.lt.s32.totalorder %s377_s26, %s377_s26  ;;  %p1214_p12 = scmp.lt.s32.totalorder %s1205_s12, %s1205_s12 }
  0x13   : > { %p1208_p9 = pnand %p1207_p8, %p1206_p7 }
  0x14   : > { %p1215_p13 = por %p1214_p12, %p1213_p11 }
  0x15   : > { %p1209_p10 = pneg %p1208_p9 }
  0x17   : > { %p1216_p0 = pnand %p1215_p13, %p1209_p10 }
  0x19   : > { %1219 = shalt.err (!%p1216_p0)
}
  0x1a   : > { %s1267_s13 = smov [#allocation2]   ;;  %s1220_s14 = scalar_lea.vmem %s388_s29, 16 }
  0x1b   : > { %1171 = dma.vmem_to_smem (!%p1368_p6), %s377_s26, 64, %s1267_s13, [#allocation3]  }
  0x1c   : > { %p1221_p1 = scmp.ne.s32.totalorder %s388_s29, %s1220_s14  ;;  %p1228_p4 = scmp.lt.s32.totalorder %s388_s29, %s388_s29 }
  0x1d   : > { %p1229_p3 = scmp.lt.s32.totalorder %s1220_s14, %s1220_s14 }
  0x1e   : > { %p1223_p2 = pnand %p1221_p1, %p1207_p8 }
  0x1f   : > { %p1230_p7 = por %p1229_p3, %p1228_p4 }
  0x20   : > { %p1224_p5 = pneg %p1223_p2 }
  0x22   : > { %p1231_p9 = pnand %p1230_p7, %p1224_p5 }
  0x24   : > { %1234 = shalt.err (!%p1231_p9)
}
  0x25   : > { %s1268_s15 = smov [#allocation4]   ;;  %p1540_p10 = scmp.ne.s32.totalorder %s1535_s22, 0 }
  0x26   : > { %1174 = dma.vmem_to_smem (!%p1368_p6), %s388_s29, 16, %s1268_s15, [#allocation5]  }
  0x27   : > { %451 = sbr.rel (%p1540_p10) target bundleno = 103 (0x67), region = 48  ;;  %p1541_p11 = scmp.ne.s32.totalorder (!%p1540_p10), %s1536_s23, 0 }
  0x2e   : > { %1248 = dma.done.wait (%p1541_p11), [#allocation3], 64  }
  0x2f   : > { %1250 = vsyncadd (%p1541_p11), [#allocation3], 4294967232 }
  0x30   : > { %1252 = dma.done.wait (%p1541_p11), [#allocation5], 16  }
  0x31   : > { %1254 = vsyncadd (%p1541_p11), [#allocation5], 4294967280 }
  0x32   : > { %461 = sfence }
  0x33   : > { %p557_p3 = scmp.lt.s32.totalorder %s1257_s17, 1  ;;  %s629_s16 = sld [smem:[#allocation2]]  ;;  %v707_v0 = vlaneseq  ;;  %vm781_vm5 = vcmask 1040384   ;;  %vm783_vm6 = vcmask 1041408   ;;  %vm785_vm7 = vcmask 1042432  }
  0x34   : > { %s1136_s20 = sld [smem:[#allocation2 + $0x80]]  ;;  %s1132_s30 = sld [smem:[#allocation2 + $0x1]] }
  0x35   : > { %s1141_s22 = sld [smem:[#allocation2 + $0x100]]  ;;  %s1547_s17 = smov (!%p557_p3, %s1257_s17), 1  ;;  %v708_v1 = vshrl.u32 %v707_v0, 7  ;;  %v710_v12 = vand.u32 127, %v707_v0 }
  0x36   : > { %s1146_s24 = sld [smem:[#allocation2 + $0x180]]  ;;  %s1159_s25 = sshll.u32 %s1547_s17, 5 }
  0x37   : > { %s564_s23 = scalar_lea.vmem %s1520_s2, %s1159_s25  ;;  %s1396_s28 = sld [smem:[#allocation4]]  ;;  %v714_v13 = vmul.u32 128, %v708_v1 }
  0x38   : > { %v1398_v2 = vld [vmem:[%s564_s23] sm:$0xff]  ;;  %v1400_v4 = vld [vmem:[%s564_s23 + $0x8] sm:$0xff]  ;;  %v1402_v5 = vld [vmem:[%s564_s23 + $0x10] sm:$0xff]  ;;  %s1405_s29 = sshll.u32 %s1547_s17, 3  ;;  %s1137_s12 = sld [smem:[#allocation2 + $0x81]] }
  0x39   : > { %v630_v3 = vstv %s629_s16  ;;  %v1408_v9 = vld [vmem:[%s564_s23 + $0x18] sm:$0xff]  ;;  %s1142_s13 = sld [smem:[#allocation2 + $0x101]]  ;;  %s1421_s25 = sld [smem:[#allocation2 + $0x2]]  ;;  %v1425_v18 = vadd.s32 %v714_v13, %v710_v12 }
  0x3a   : > { %v631_v6 = vmul.f32 %v630_v3, %v1398_v2  ;;  %v644_v7 = vstv %s1136_s20  ;;  %s1412_s14 = sld [smem:[#allocation2 + $0x181]]  ;;  %s1423_s26 = sld [smem:[#allocation2 + $0x82]]  ;;  %v633_v20 = vstv %s1132_s30 }
  0x3b   : > { %v662_v8 = vstv %s1141_s22  ;;  %v645_v10 = vmul.f32 %v1400_v4, %v644_v7  ;;  %s1414_s15 = sld [smem:[#allocation4 + $0x1]]  ;;  %s571_s22 = scalar_lea.vmem %s1521_s3, %s1405_s29  ;;  %v634_v22 = vmul.f32 %v633_v20, %v1398_v2  ;;  %vm716_vm0 = vcmp.lt.s32.totalorder %v1425_v18, 256 }
  0x3c   : > { %v663_v11 = vmul.f32 %v1402_v5, %v662_v8  ;;  %v680_v14 = vstv %s1146_s24  ;;  %s1427_s24 = sld [smem:[#allocation2 + $0x102]]  ;;  %s599_s0 = scalar_lea.vmem %s1525_s7, %s1405_s29  ;;  %v718_v25 = vld [vmem:[%s571_s22] sm:$0xff] }
  0x3d   : > { %v646_v15 = vadd.f32 %v645_v10, %v631_v6  ;;  %v681_v16 = vmul.f32 %v1408_v9, %v680_v14  ;;  %s1429_s27 = sld [smem:[#allocation2 + $0x182]]  ;;  %v696_v19 = vstv %s1396_s28  ;;  %s1439_s1 = sld [smem:[#allocation2 + $0x3]] }
  0x3e   : > { %s1432_s23 = sld [smem:[#allocation4 + $0x2]]  ;;  %v648_v23 = vstv %s1137_s12  ;;  %s1444_s28 = sld [smem:[#allocation2 + $0x83]] }
  0x3f   : > { %v664_v17 = vadd.f32 %v663_v11, %v646_v15  ;;  %v666_v24 = vstv %s1142_s13  ;;  %v649_v26 = vmul.f32 %v1400_v4, %v648_v23  ;;  %s1446_s30 = sld [smem:[#allocation2 + $0x103]]  ;;  %v636_v33 = vstv %s1421_s25  ;;  %s613_s20 = scalar_lea.vmem %s1527_s9, %s1405_s29 }
  0x40   : > { %v667_v27 = vmul.f32 %v1402_v5, %v666_v24  ;;  %v684_v28 = vstv %s1412_s14  ;;  %s1450_s12 = sld [smem:[#allocation2 + $0x183]]  ;;  %v652_v34 = vstv %s1423_s26  ;;  %v637_v36 = vmul.f32 %v636_v33, %v1398_v2  ;;  %s606_s26 = scalar_lea.vmem %s1526_s8, %s1405_s29 }
  0x41   : > { %v682_v21 = vadd.f32 %v681_v16, %v664_v17  ;;  %v699_v30 = vstv %s1414_s15  ;;  %v650_v31 = vadd.f32 %v649_v26, %v634_v22  ;;  %v685_v32 = vmul.f32 %v1408_v9, %v684_v28  ;;  %s578_s15 = scalar_lea.vmem %s1522_s4, %s1405_s29 }
  0x42   : > { %v653_v37 = vmul.f32 %v1400_v4, %v652_v34  ;;  %v670_v38 = vstv %s1427_s24  ;;  %v734_v53 = vld [vmem:[%s578_s15] sm:$0xff]  ;;  %s620_s15 = scalar_lea.vmem %s1528_s10, %s1405_s29 }
  0x43   : > { %v697_v29 = vadd.f32 %v696_v19, %v682_v21  ;;  %v668_v39 = vadd.f32 %v667_v27, %v650_v31  ;;  %v671_v40 = vmul.f32 %v1402_v5, %v670_v38  ;;  %v688_v41 = vstv %s1429_s27 }
  0x44   : > { %v702_v42 = vstv %s1432_s23  ;;  %v654_v45 = vadd.f32 %v653_v37, %v637_v36  ;;  %v689_v46 = vmul.f32 %v1408_v9, %v688_v41  ;;  %v639_v48 = vstv %s1439_s1  ;;  %s585_s23 = scalar_lea.vmem %s1523_s5, %s1405_s29 }
  0x45   : > { %717 = vst [vmem:[%s599_s0] sm:$0xff] %v697_v29  ;;  %v719_v35 = vsub.f32 %v697_v29, %v718_v25  ;;  %s1466_s0 = sld [smem:[#allocation4 + $0x3]]  ;;  %v686_v47 = vadd.f32 %v685_v32, %v668_v39  ;;  %v656_v49 = vstv %s1444_s28  ;;  %v674_v50 = vstv %s1446_s30  ;;  %v750_v0 = vld [vmem:[%s585_s23] sm:$0xff] }
  0x46   : > { %v672_v54 = vadd.f32 %v671_v40, %v654_v45  ;;  %v640_v56 = vmul.f32 %v639_v48, %v1398_v2  ;;  %v657_v57 = vmul.f32 %v1400_v4, %v656_v49  ;;  %v675_v58 = vmul.f32 %v1402_v5, %v674_v50 }
  0x47   : > { %v720_v43 = vand.u32 2147483647, %v719_v35  ;;  %v722_v44 = vmul.f32 0.5, %v719_v35  ;;  %v700_v55 = vadd.f32 %v699_v30, %v686_v47  ;;  %v692_v61 = vstv %s1450_s12  ;;  %s592_s12 = scalar_lea.vmem %s1524_s6, %s1405_s29  ;;  %s1131_s29 = sshll.u32 %s1547_s17, 2 }
  0x48   : > { %v690_v60 = vadd.f32 %v689_v46, %v672_v54  ;;  %v658_v1 = vadd.f32 %v657_v57, %v640_v56  ;;  %v693_v2 = vmul.f32 %v1408_v9, %v692_v61  ;;  %v766_v16 = vld [vmem:[%s592_s12] sm:$0xff]  ;;  %s627_s25 = scalar_lea.vmem %s1529_s11, %s1131_s29 }
  0x49   : > { %vm721_vm1 = vcmp.lt.f32.partialorder %v720_v43, 1.0  ;;  %v723_v51 = vmul.f32 %v722_v44, %v719_v35  ;;  %v1153_v52 = vadd.f32 -0.5, %v720_v43  ;;  %733 = vst [vmem:[%s606_s26] sm:$0xff] %v700_v55  ;;  %v735_v63 = vsub.f32 %v700_v55, %v734_v53 }
  0x4a   : > { %v703_v4 = vadd.f32 %v702_v42, %v690_v60  ;;  %v676_v7 = vadd.f32 %v675_v58, %v658_v1 }
  0x4b   : > { %v725_v59 = vsel %vm721_vm1, %v723_v51, %v1153_v52  ;;  %v736_v5 = vand.u32 2147483647, %v735_v63  ;;  %v738_v6 = vmul.f32 0.5, %v735_v63  ;;  %v705_v10 = vstv %s1466_s0 }
  0x4c   : > { %v726_v62 = vsel %vm716_vm0, %v725_v59, 0.0  ;;  %749 = vst [vmem:[%s613_s20] sm:$0xff] %v703_v4  ;;  %v751_v8 = vsub.f32 %v703_v4, %v750_v0  ;;  %v694_v14 = vadd.f32 %v693_v2, %v676_v7 }
  0x4d   : > { %v727_v3 = vrot.slane %v726_v62, 4  ;;  %vm737_vm2 = vcmp.lt.f32.partialorder %v736_v5, 1.0  ;;  %v739_v12 = vmul.f32 %v738_v6, %v735_v63  ;;  %v1154_v13 = vadd.f32 -0.5, %v736_v5 }
  0x4e   : > { %v752_v15 = vand.u32 2147483647, %v751_v8  ;;  %v754_v9 = vmul.f32 0.5, %v751_v8  ;;  %v706_v19 = vadd.f32 %v705_v10, %v694_v14 }
  0x4f   : > { %v728_v11 = vadd.f32 %v727_v3, %v726_v62  ;;  %v741_v17 = vsel %vm737_vm2, %v739_v12, %v1154_v13 }
  0x50   : > { %v742_v21 = vsel %vm716_vm0, %v741_v17, 0.0  ;;  %vm753_vm3 = vcmp.lt.f32.partialorder %v752_v15, 1.0  ;;  %v755_v22 = vmul.f32 %v754_v9, %v751_v8  ;;  %v1155_v23 = vadd.f32 -0.5, %v752_v15  ;;  %765 = vst [vmem:[%s620_s15] sm:$0xff] %v706_v19 }
  0x51   : > { %v729_v20 = vrot.slane %v728_v11, 2  ;;  %v743_v24 = vrot.slane %v742_v21, 4  ;;  %v767_v25 = vsub.f32 %v706_v19, %v766_v16 }
  0x52   : > { %v757_v26 = vsel %vm753_vm3, %v755_v22, %v1155_v23 }
  0x53   : > { %v768_v27 = vand.u32 2147483647, %v767_v25  ;;  %v770_v28 = vmul.f32 0.5, %v767_v25  ;;  %v730_v29 = vadd.f32 %v729_v20, %v728_v11  ;;  %v744_v30 = vadd.f32 %v743_v24, %v742_v21 }
  0x54   : > { %v758_v31 = vsel %vm716_vm0, %v757_v26, 0.0 }
  0x55   : > { %vm769_vm4 = vcmp.lt.f32.partialorder %v768_v27, 1.0  ;;  %v771_v32 = vmul.f32 %v770_v28, %v767_v25  ;;  %v1156_v33 = vadd.f32 -0.5, %v768_v27  ;;  %v745_v34 = vrot.slane %v744_v30, 2 }
  0x56   : > { %v759_v35 = vrot.slane %v758_v31, 4  ;;  %v731_v36 = vrot.slane %v730_v29, 1 }
  0x57   : > { %v773_v37 = vsel %vm769_vm4, %v771_v32, %v1156_v33  ;;  %v746_v38 = vadd.f32 %v745_v34, %v744_v30 }
  0x58   : > { %v760_v39 = vadd.f32 %v759_v35, %v758_v31  ;;  %v774_v40 = vsel %vm716_vm0, %v773_v37, 0.0  ;;  %v732_v44 = vadd.f32 %v731_v36, %v730_v29 }
  0x59   : > { %v775_v41 = vrot.slane %v774_v40, 4  ;;  %v747_v42 = vrot.slane %v746_v38, 1 }
  0x5a   : > { %v761_v43 = vrot.slane %v760_v39, 2 }
  0x5b   : > { %v776_v45 = vadd.f32 %v775_v41, %v774_v40  ;;  %v748_v46 = vadd.f32 %v747_v42, %v746_v38 }
  0x5c   : > { %v762_v47 = vadd.f32 %v761_v43, %v760_v39 }
  0x5d   : > { %v777_v48 = vrot.slane %v776_v45, 2  ;;  %v782_v51 = vsel %vm781_vm5, %v732_v44, %v748_v46 }
  0x5e   : > { %v763_v49 = vrot.slane %v762_v47, 1 }
  0x5f   : > { %v778_v50 = vadd.f32 %v777_v48, %v776_v45 }
  0x60   : > { %v764_v52 = vadd.f32 %v763_v49, %v762_v47 }
  0x61   : > { %v779_v53 = vrot.slane %v778_v50, 1 }
  0x62   : > { %v784_v54 = vsel %vm783_vm6, %v782_v51, %v764_v52 }
  0x63   : > { %v780_v18 = vadd.f32 %v779_v53, %v778_v50 }
  0x65   : > { %v786_v55 = vsel %vm785_vm7, %v784_v54, %v780_v18 }
  0x66   : > { %787 = vst [vmem:[%s627_s25] sm:$0xf] %v786_v55 }
  0x67 PF: > { %s24_s19 = sadd.s32 1, %s1265_s19   ;;  %s1542_s17 = smov %s1261_s18 }
  0x68   : > { %p21_p4 = scmp.ge.s32.totalorder %s24_s19, 4   ;;  %s1543_s18 = smov %s1545_s21 }
  0x6a   :  { %23 = sbr.rel (!%p21_p4) target bundleno = 6 (0x6), region = 150 }
  0x71   :  { %893 = vsyncpa [#allocation3], 1 }
  0x72   :  { %895 = vsyncpa [#allocation3 + $0x1], 1 }
  0x73   :  { %896 = vsyncpa [#allocation5], 1 }

</bundles_post_ra>
